<compile_context>
chip_gen: v5e
topology: v5e:2x2
jax: 0.10.0
libtpu: 0.0.40
codegen_flags: <defaults>
</compile_context>

<pallas_src>
import jax
import jax.numpy as jnp
from jax.experimental import pallas as pl
from jax.experimental.pallas import tpu as pltpu


def _single_variance_kernel(var_ref, out_ref):
    """var_ref: (1,) SMEM parameter; out_ref: (block_rows, 128) VMEM tile.

    The binding resource is the output HBM DMA; the exp (EUP) and splat (VPU)
    are free filler slots, so keep them in-kernel.
    """
    val = jnp.exp(var_ref[0] * 10.0)
    out_ref[...] = jnp.full(out_ref.shape, val, dtype=out_ref.dtype)


def single_variance_forward(x: jax.Array, variance: jax.Array, *,
                            block_rows: int = 8192,
                            min_pallas_n: int = 1 << 16) -> jax.Array:
    """Pallas equivalent of SingleVarianceNetwork.forward(x) -> (N, 1) float32."""
    n = int(x.shape[0])
    variance = jnp.asarray(variance, jnp.float32).reshape(1)

    if n == 0:
        return jnp.zeros((0, 1), jnp.float32)

    if n < min_pallas_n or n % 128 != 0:
        # Fast path: XLA fuses this broadcast into downstream NeuS math and
        # often never materializes it. Non-multiple-of-128 N would otherwise
        # need a slab slice (a full extra HBM read + write), so it also lands
        # here.
        return jnp.full((n, 1), jnp.exp(variance[0] * 10.0), dtype=jnp.float32)

    # Lane-dense slab: N scalars laid out as (rows, 128); every store is a
    # full-width unmasked vst.
    rows = n // 128

    if rows < 1024:
        block_r = rows          # single block == full array (always legal)
        grid = (1,)
    else:
        # At least 2 blocks so the "parallel" grid axis can shard across
        # v7x's 2 TensorCores; 8 MiB double-buffered output stays under every
        # generation's scoped-VMEM default.
        block_r = min(block_rows, pl.cdiv(rows, 2))
        block_r = -(-block_r // 8) * 8           # sublane-aligned (8, 128) tile
        grid = (pl.cdiv(rows, block_r),)         # partial edge block is masked

    slab = pl.pallas_call(
        _single_variance_kernel,
        out_shape=jax.ShapeDtypeStruct((rows, 128), jnp.float32),
        grid=grid,
        in_specs=[
            # Scalar parameter lives in SMEM, shared by every grid step.
            pl.BlockSpec(memory_space=pltpu.MemorySpace.SMEM),
        ],
        out_specs=pl.BlockSpec((block_r, 128), lambda i: (i, 0)),
        compiler_params=pltpu.CompilerParams(
            # no-op on v5e/v6e (1 TC); shards the writeback on v7x's 2 TCs
            dimension_semantics=("parallel",)),
    )(variance)

    # n == rows * 128, so this reshape is a free row-major bitcast.
    return slab.reshape(n, 1)


def single_variance_get_variance(variance: jax.Array) -> jax.Array:
    """Equivalent of SingleVarianceNetwork.get_variance().

    Scalar exp + clip: plain XLA is strictly faster than a Pallas launch.
    """
    variance = jnp.asarray(variance, jnp.float32).reshape(1)
    return jnp.clip(jnp.exp(variance * 10.0), 1e-06, 1e06)


if __name__ == "__main__":
    key = jax.random.PRNGKey(0)

    # Parameter init matching nn.Parameter(init_val * torch.ones(1)).
    init_val = 0.3
    variance = jnp.full((1,), init_val, dtype=jnp.float32)

    def ref_fwd(n):
        return jnp.ones((n, 1), jnp.float32) * jnp.exp(variance * 10.0)

    # 1) Small shape (N multiple of 128), force the Pallas path.
    n1 = 256
    x1 = jax.random.normal(key, (n1, 3), dtype=jnp.float32)
    out1 = jax.block_until_ready(
        single_variance_forward(x1, variance, min_pallas_n=0))
    assert out1.shape == (n1, 1)
    assert jnp.allclose(out1, ref_fwd(n1), rtol=1e-6, atol=1e-6)

    # 2) N not a multiple of 128 -> fused jnp.full fast path.
    n2 = 300
    x2 = jax.random.normal(key, (n2, 3), dtype=jnp.float32)
    out2 = jax.block_until_ready(single_variance_forward(x2, variance))
    assert out2.shape == (n2, 1)
    assert jnp.allclose(out2, ref_fwd(n2), rtol=1e-6, atol=1e-6)

    # 3) Multi-block Pallas path (rows >= 1024), small block for test purposes.
    n3 = 1024 * 128
    x3 = jax.random.normal(key, (n3, 3), dtype=jnp.float32)
    out3 = jax.block_until_ready(
        single_variance_forward(x3, variance, block_rows=256, min_pallas_n=0))
    assert out3.shape == (n3, 1)
    assert jnp.allclose(out3, ref_fwd(n3), rtol=1e-6, atol=1e-6)

    # 4) n == 0 edge case.
    x0 = jnp.zeros((0, 3), jnp.float32)
    out0 = jax.block_until_ready(single_variance_forward(x0, variance))
    assert out0.shape == (0, 1)

    # 5) get_variance.
    var_out = jax.block_until_ready(single_variance_get_variance(variance))
    assert jnp.allclose(
        var_out, jnp.clip(jnp.exp(variance * 10.0), 1e-06, 1e06), rtol=1e-6)

    print("KERNEL_OK")
</pallas_src>

<mosaic_0001>
module attributes {stable_mosaic.version = 11 : i64} {
  func.func @_single_variance_kernel(%arg0: i32, %arg1: memref<1xf32, #tpu.memory_space<smem>>, %arg2: memref<2x128xf32, #tpu.memory_space<vmem>>) attributes {dimension_semantics = [#tpu.dimension_semantics<parallel>], iteration_bounds = array<i64: 1>, scalar_prefetch = 0 : i64, scratch_operands = 0 : i64, tpu.core_type = #tpu.core_type<tc>, window_params = [{transform_indices = @transform_0, window_bounds = array<i64: 1>}, {transform_indices = @transform_1, window_bounds = array<i64: 2, 128>}]} {
    %c0 = arith.constant 0 : index
    %0 = memref.load %arg1[%c0] : memref<1xf32, #tpu.memory_space<smem>>
    %cst = arith.constant 1.000000e+01 : f32
    %1 = arith.mulf %0, %cst : f32
    %2 = math.exp %1 : f32
    %3 = vector.broadcast %2 : f32 to vector<2x128xf32>
    %c0_0 = arith.constant 0 : index
    %c0_1 = arith.constant 0 : index
    %4 = vector.load %arg2[%c0_0, %c0_1] : memref<2x128xf32, #tpu.memory_space<vmem>>, vector<2x128xf32>
    tpu.vector_store %arg2[%c0_0, %c0_1], %3 {strides = array<i32>} : memref<2x128xf32, #tpu.memory_space<vmem>>, vector<2x128xf32>,
    return
  }
  func.func @transform_0(%arg0: i32) -> i32 {
    %c0_i32 = arith.constant 0 : i32
    %c0_i32_0 = arith.constant 0 : i32
    return %c0_i32 : i32
  }
  func.func @transform_1(%arg0: i32) -> (i32, i32) {
    %c0_i32 = arith.constant 0 : i32
    %c0_i32_0 = arith.constant 0 : i32
    return %arg0, %c0_i32 : i32, i32
  }
}

</mosaic_0001>

<bundles_post_ra>
// kernel: tpu_custom_call.1
= control target key start
LH: loop header
LB: loop body
LE: loop exit
PB: predicated region body
PF: predicated region fallthrough
CT: control target
= control target key end

     0   :  { %s82_s0 = inlined_call_operand.<no memory space> [shape: f32[1], index: 0, kind: input, shape index: {}]   ;;  %s83_s1 = inlined_call_operand.hbm [shape: f32[2,128], index: 1, kind: output, shape index: {}]  }
   0x1   :  { %s11_s8 = smul.f32 10.0, %s82_s0 }
   0x2   :  { %7 = vsyncpa [#allocation4], 0  ;;  %s65_s9 = smov [#allocation3]   ;;  %s25_s13 = sshll.u32 %s83_s1, 4  ;;  %s26_s13 = int_to_ptr.hbm [resolvable:$true] %s25_s13 }
   0x3   :  { %v12_v0 = vstv %s11_s8  ;;  %s23_s10 = sshll.u32 %s65_s9, 4  ;;  %s24_s10 = int_to_ptr.vmem [resolvable:$true] %s23_s10 }
   0x4   :  { %v13_v1 = vmul.f32 1.442695, %v12_v0 }
   0x6   :  { %37 = vpow2.f32 %v13_v1 }
   0xc   :  { %v38_v2 = vpop.eup %37 }
   0xd   :  { %34 = vpush %v38_v2 }
  0x3e   :  { %s35_s14 = spop %34 }
  0x3f   :  { %v16_v3 = vstv %s35_s14 }
  0x40   :  { %17 = vst [vmem:[#allocation3] sm:$0x3] %v16_v3 }
  0x41   :  { %28 = dma.vmem_to_hbm [thread:$0]  %s24_s10, 32, %s26_s13, [#allocation4]  }
  0x42   :  { %63 = dma.done.wait [#allocation4], 32  }
  0x43   :  { %64 = vsyncadd [#allocation4], 4294967264 }
  0x44   :  { %33 = vsyncpa [#allocation4], 1 }

</bundles_post_ra>
